<compile_context>
chip_gen: v7x
topology: tpu7x:2x2x1
jax: 0.10.0
libtpu: 0.0.40
codegen_flags: <defaults>
</compile_context>

<pallas_src>
import math
import jax
import jax.numpy as jnp
from jax.experimental import pallas as pl
from jax.experimental.pallas import tpu as pltpu

_LANES = 128  # lane-dense output slab width


def hypergraph_score_kernel(rel_in_ref, edge_ref, wm_ref, bm_ref, wc_ref,
                            bc_ref, out_ref):
    """One batch element per grid step: pos + K neg relations at once.

    rel_in_ref : [1, K+1, 2D]  cat([rel_base, rel_attr], -1), pos row first
    edge_ref   : [1, 1, D]     hyper_edge_emb for this batch element
    wm_ref     : [2D, D]       rel_merge weight (pre-transposed), VMEM-resident
    bm_ref     : [1, D]        rel_merge bias
    wc_ref     : [1, D]        ce_predictor weight row
    bc_ref     : [1]           ce_predictor bias (SMEM scalar)
    out_ref    : [1, K+1, 128] lane-dense score slab (score in every lane)
    """
    rel_in = rel_in_ref[0]                                  # [K+1, 2D]

    # rel_cat: sigmoid(cat([rb, ra]) @ Wm^T + bm) as a single fused matmul.
    rel = jax.nn.sigmoid(
        jnp.dot(rel_in, wm_ref[...], preferred_element_type=jnp.float32)
        + bm_ref[...])                                      # [K+1, D]

    # mul_pre_score: sigmoid(sum_d edge_d * rel_d * wc_d + bc).
    # Fold edge and wc into one row so the final "matvec" is a VPU multiply
    # plus a lane reduction (no N=1 MXU matmul).
    ew = edge_ref[0] * wc_ref[...]                          # [1, D]
    logits = jnp.sum(rel * ew, axis=-1, keepdims=True) + bc_ref[0]   # [K+1, 1]
    score = jax.nn.sigmoid(logits)                          # [K+1, 1]

    # Lane-dense store: broadcast the score column across all 128 lanes.
    out_ref[0] = jnp.broadcast_to(score, out_ref.shape[1:])


def hypergraph_v3_score(edge, rb_pos, ra_pos, rb_neg, ra_neg, params):
    """Equivalent of HyperGraphV3.score (mode='train') given encoder outputs."""
    wm, bm, wc_row, bc = params
    B, D = edge.shape
    BK = rb_neg.shape[0]
    K = BK // B
    KP = K + 1

    # Stack pos + neg rows per batch element (pos first) and fuse rel_base /
    # rel_attr along the feature axis -> one [B, K+1, 2D] operand.
    rb_all = jnp.concatenate([rb_pos[:, None, :], rb_neg.reshape(B, K, D)], axis=1)
    ra_all = jnp.concatenate([ra_pos[:, None, :], ra_neg.reshape(B, K, D)], axis=1)
    rel_in = jnp.concatenate([rb_all, ra_all], axis=-1)     # [B, K+1, 2D]
    edge3 = edge[:, None, :]                                # [B, 1, D] (no K-repeat)

    out = pl.pallas_call(
        hypergraph_score_kernel,
        grid=(B,),
        out_shape=jax.ShapeDtypeStruct((B, KP, _LANES), jnp.float32),
        in_specs=[
            pl.BlockSpec((1, KP, 2 * D), lambda b: (b, 0, 0)),    # rel_in
            pl.BlockSpec((1, 1, D), lambda b: (b, 0, 0)),         # edge
            pl.BlockSpec((2 * D, D), lambda b: (0, 0)),           # wm (resident)
            pl.BlockSpec((1, D), lambda b: (0, 0)),               # bm (resident)
            pl.BlockSpec((1, D), lambda b: (0, 0)),               # wc (resident)
            pl.BlockSpec(memory_space=pltpu.MemorySpace.SMEM),    # bc scalar
        ],
        out_specs=pl.BlockSpec((1, KP, _LANES), lambda b: (b, 0, 0)),
        compiler_params=pltpu.CompilerParams(
            dimension_semantics=("parallel",)),   # 2 TCs on v7x; no-op v5e/v6e
    )(rel_in, edge3, wm, bm, wc_row, bc)

    # Slice the lane-dense slab back to [B, K+1, 1] (layout plumbing only).
    score = out[:, :, 0:1]
    binery_label = jnp.zeros_like(score).at[:, 0].set(1.0)
    return score, binery_label


def init_params(key, embedding_dim):
    """Deterministic nn.Linear-style init (uniform(-1/sqrt(fan_in), +))."""
    D = embedding_dim
    k_merge_w, k_merge_b, k_ce_w, k_ce_b = jax.random.split(key, 4)

    # rel_merge: Linear(2D -> D); torch layout [out, in] = [D, 2D].
    bound_m = 1.0 / math.sqrt(2 * D)
    w_merge = jax.random.uniform(k_merge_w, (D, 2 * D), jnp.float32,
                                 -bound_m, bound_m)
    b_merge = jax.random.uniform(k_merge_b, (1, D), jnp.float32,
                                 -bound_m, bound_m)
    wm = w_merge.T                     # [2D, D]

    # ce_predictor: Linear(D -> 1); torch layout [out, in] = [1, D].
    bound_c = 1.0 / math.sqrt(D)
    wc_row = jax.random.uniform(k_ce_w, (1, D), jnp.float32, -bound_c, bound_c)
    bc = jax.random.uniform(k_ce_b, (1,), jnp.float32, -bound_c, bound_c)

    return wm, b_merge, wc_row, bc


def reference_score(edge, rb_pos, ra_pos, rb_neg, ra_neg, params):
    """Plain-JAX reference mirroring the PyTorch math for verification."""
    wm, bm, wc_row, bc = params
    B, D = edge.shape
    K = rb_neg.shape[0] // B
    pos_rel = jax.nn.sigmoid(jnp.concatenate([rb_pos, ra_pos], -1) @ wm + bm)
    neg_rel = jax.nn.sigmoid(jnp.concatenate([rb_neg, ra_neg], -1) @ wm + bm)
    pos_score = jax.nn.sigmoid(
        jnp.sum((edge * pos_rel) * wc_row, axis=-1, keepdims=True) + bc[0])   # [B,1]
    neg_sim = edge[:, None, :] * neg_rel.reshape(B, K, D)
    neg_score = jax.nn.sigmoid(
        jnp.sum(neg_sim * wc_row[0], axis=-1) + bc[0])                        # [B,K]
    return jnp.concatenate([pos_score[:, :, None], neg_score[:, :, None]], axis=1)


if __name__ == "__main__":
    embedding_dim = 32     # hyperkgeConfig.embedding_dim
    batch = 2
    n_neg = 4              # number of negative relations per example

    key = jax.random.PRNGKey(0)
    k_params, k_edge, k_rbp, k_rap, k_rbn, k_ran = jax.random.split(key, 6)

    params = init_params(k_params, embedding_dim)

    # Stand-ins for HyperCE encoder outputs (see TODO above).
    edge = jax.random.normal(k_edge, (batch, embedding_dim), jnp.float32)
    rb_pos = jax.random.normal(k_rbp, (batch, embedding_dim), jnp.float32)
    ra_pos = jax.random.normal(k_rap, (batch, embedding_dim), jnp.float32)
    rb_neg = jax.random.normal(k_rbn, (batch * n_neg, embedding_dim), jnp.float32)
    ra_neg = jax.random.normal(k_ran, (batch * n_neg, embedding_dim), jnp.float32)

    score, binery_label = hypergraph_v3_score(
        edge, rb_pos, ra_pos, rb_neg, ra_neg, params)
    score = jax.block_until_ready(score)

    ref = reference_score(edge, rb_pos, ra_pos, rb_neg, ra_neg, params)
    assert score.shape == (batch, 1 + n_neg, 1)
    assert binery_label.shape == score.shape
    assert jnp.allclose(score, ref, atol=1e-5, rtol=1e-5), \
        float(jnp.max(jnp.abs(score - ref)))
    assert float(binery_label[0, 0, 0]) == 1.0
    assert float(binery_label[0, 1, 0]) == 0.0

    print("KERNEL_OK")
</pallas_src>

<mosaic_0001>
module attributes {stable_mosaic.version = 11 : i64} {
  func.func @hypergraph_score_kernel(%arg0: i32, %arg1: memref<1x5x64xf32, #tpu.memory_space<vmem>>, %arg2: memref<1x1x32xf32, #tpu.memory_space<vmem>>, %arg3: memref<64x32xf32, #tpu.memory_space<vmem>>, %arg4: memref<1x32xf32, #tpu.memory_space<vmem>>, %arg5: memref<1x32xf32, #tpu.memory_space<vmem>>, %arg6: memref<1xf32, #tpu.memory_space<smem>>, %arg7: memref<1x5x128xf32, #tpu.memory_space<vmem>>) attributes {dimension_semantics = [#tpu.dimension_semantics<parallel>], iteration_bounds = array<i64: 2>, scalar_prefetch = 0 : i64, scratch_operands = 0 : i64, tpu.core_type = #tpu.core_type<tc>, window_params = [{transform_indices = @transform_0, window_bounds = array<i64: 1, 5, 64>}, {transform_indices = @transform_1, window_bounds = array<i64: 1, 1, 32>}, {pipeline_mode = #tpu.pipeline_mode<synchronous>, transform_indices = @transform_2, window_bounds = array<i64: 64, 32>}, {pipeline_mode = #tpu.pipeline_mode<synchronous>, transform_indices = @transform_3, window_bounds = array<i64: 1, 32>}, {pipeline_mode = #tpu.pipeline_mode<synchronous>, transform_indices = @transform_4, window_bounds = array<i64: 1, 32>}, {transform_indices = @transform_5, window_bounds = array<i64: 1>}, {transform_indices = @transform_6, window_bounds = array<i64: 1, 5, 128>}]} {
    %c0 = arith.constant 0 : index
    %c0_0 = arith.constant 0 : index
    %c0_1 = arith.constant 0 : index
    %0 = vector.load %arg1[%c0, %c0_0, %c0_1] : memref<1x5x64xf32, #tpu.memory_space<vmem>>, vector<1x5x64xf32>
    %1 = vector.shape_cast %0 : vector<1x5x64xf32> to vector<5x64xf32>
    %c0_2 = arith.constant 0 : index
    %c0_3 = arith.constant 0 : index
    %2 = vector.load %arg3[%c0_2, %c0_3] : memref<64x32xf32, #tpu.memory_space<vmem>>, vector<64x32xf32>
    %cst = arith.constant dense<0.000000e+00> : vector<5x32xf32>
    %3 = tpu.matmul %1, %2, %cst {dimension_numbers = #tpu.dot_dimension_numbers<[1], [0], [0], [1], [0, 0, 1, 1], [], []>} : vector<5x64xf32>, vector<64x32xf32>, vector<5x32xf32> -> vector<5x32xf32>
    %c0_4 = arith.constant 0 : index
    %c0_5 = arith.constant 0 : index
    %4 = vector.load %arg4[%c0_4, %c0_5] : memref<1x32xf32, #tpu.memory_space<vmem>>, vector<1x32xf32>
    %5 = vector.broadcast %4 : vector<1x32xf32> to vector<5x32xf32>
    %6 = arith.addf %3, %5 : vector<5x32xf32>
    %7 = arith.negf %6 : vector<5x32xf32>
    %8 = math.exp %7 : vector<5x32xf32>
    %cst_6 = arith.constant 1.000000e+00 : f32
    %9 = vector.broadcast %cst_6 : f32 to vector<5x32xf32>
    %10 = arith.addf %9, %8 : vector<5x32xf32>
    %11 = arith.divf %9, %10 : vector<5x32xf32>
    %c0_7 = arith.constant 0 : index
    %c0_8 = arith.constant 0 : index
    %c0_9 = arith.constant 0 : index
    %12 = vector.load %arg2[%c0_7, %c0_8, %c0_9] : memref<1x1x32xf32, #tpu.memory_space<vmem>>, vector<1x1x32xf32>
    %13 = vector.shape_cast %12 : vector<1x1x32xf32> to vector<1x32xf32>
    %c0_10 = arith.constant 0 : index
    %c0_11 = arith.constant 0 : index
    %14 = vector.load %arg5[%c0_10, %c0_11] : memref<1x32xf32, #tpu.memory_space<vmem>>, vector<1x32xf32>
    %15 = arith.mulf %13, %14 : vector<1x32xf32>
    %16 = vector.broadcast %15 : vector<1x32xf32> to vector<5x32xf32>
    %17 = arith.mulf %11, %16 : vector<5x32xf32>
    %cst_12 = arith.constant dense<0.000000e+00> : vector<5xf32>
    %18 = vector.multi_reduction <add>, %17, %cst_12 [1] : vector<5x32xf32> to vector<5xf32>
    %19 = vector.shape_cast %18 : vector<5xf32> to vector<5x1xf32>
    %c0_13 = arith.constant 0 : index
    %20 = memref.load %arg6[%c0_13] : memref<1xf32, #tpu.memory_space<smem>>
    %21 = vector.broadcast %20 : f32 to vector<5x1xf32>
    %22 = arith.addf %19, %21 : vector<5x1xf32>
    %23 = arith.negf %22 : vector<5x1xf32>
    %24 = math.exp %23 : vector<5x1xf32>
    %cst_14 = arith.constant 1.000000e+00 : f32
    %25 = vector.broadcast %cst_14 : f32 to vector<5x1xf32>
    %26 = arith.addf %25, %24 : vector<5x1xf32>
    %27 = arith.divf %25, %26 : vector<5x1xf32>
    %28 = vector.shape_cast %27 : vector<5x1xf32> to vector<5x1xf32>
    %29 = vector.broadcast %28 : vector<5x1xf32> to vector<5x128xf32>
    %c0_15 = arith.constant 0 : index
    %c0_16 = arith.constant 0 : index
    %c0_17 = arith.constant 0 : index
    %30 = vector.load %arg7[%c0_15, %c0_16, %c0_17] : memref<1x5x128xf32, #tpu.memory_space<vmem>>, vector<1x5x128xf32>
    %31 = vector.shape_cast %30 : vector<1x5x128xf32> to vector<5x128xf32>
    %32 = vector.shape_cast %29 : vector<5x128xf32> to vector<1x5x128xf32>
    tpu.vector_store %arg7[%c0_15, %c0_16, %c0_17], %32 {strides = array<i32>} : memref<1x5x128xf32, #tpu.memory_space<vmem>>, vector<1x5x128xf32>,
    return
  }
  func.func @transform_0(%arg0: i32) -> (i32, i32, i32) {
    %c0_i32 = arith.constant 0 : i32
    %c0_i32_0 = arith.constant 0 : i32
    %c0_i32_1 = arith.constant 0 : i32
    return %arg0, %c0_i32, %c0_i32_0 : i32, i32, i32
  }
  func.func @transform_1(%arg0: i32) -> (i32, i32, i32) {
    %c0_i32 = arith.constant 0 : i32
    %c0_i32_0 = arith.constant 0 : i32
    %c0_i32_1 = arith.constant 0 : i32
    return %arg0, %c0_i32, %c0_i32_0 : i32, i32, i32
  }
  func.func @transform_2(%arg0: i32) -> (i32, i32) {
    %c0_i32 = arith.constant 0 : i32
    %c0_i32_0 = arith.constant 0 : i32
    %c0_i32_1 = arith.constant 0 : i32
    return %c0_i32, %c0_i32_0 : i32, i32
  }
  func.func @transform_3(%arg0: i32) -> (i32, i32) {
    %c0_i32 = arith.constant 0 : i32
    %c0_i32_0 = arith.constant 0 : i32
    %c0_i32_1 = arith.constant 0 : i32
    return %c0_i32, %c0_i32_0 : i32, i32
  }
  func.func @transform_4(%arg0: i32) -> (i32, i32) {
    %c0_i32 = arith.constant 0 : i32
    %c0_i32_0 = arith.constant 0 : i32
    %c0_i32_1 = arith.constant 0 : i32
    return %c0_i32, %c0_i32_0 : i32, i32
  }
  func.func @transform_5(%arg0: i32) -> i32 {
    %c0_i32 = arith.constant 0 : i32
    %c0_i32_0 = arith.constant 0 : i32
    return %c0_i32 : i32
  }
  func.func @transform_6(%arg0: i32) -> (i32, i32, i32) {
    %c0_i32 = arith.constant 0 : i32
    %c0_i32_0 = arith.constant 0 : i32
    %c0_i32_1 = arith.constant 0 : i32
    return %arg0, %c0_i32, %c0_i32_0 : i32, i32, i32
  }
}

</mosaic_0001>

<bundles_post_ra>
// kernel: tpu_custom_call.1
= control target key start
LH: loop header
LB: loop body
LE: loop exit
PB: predicated region body
PF: predicated region fallthrough
CT: control target
= control target key end

     0   :  { %s565_s23 = smov 0   ;;  %s623_s0 = inlined_call_operand.vmem [shape: f32[2,5,64], index: 0, kind: input, shape index: {}]   ;;  %s624_s1 = inlined_call_operand.vmem [shape: f32[2,1,32], index: 1, kind: input, shape index: {}]   ;;  %s625_s2 = inlined_call_operand.vmem [shape: f32[64,32], index: 2, kind: input, shape index: {}]   ;;  %s626_s3 = inlined_call_operand.vmem [shape: f32[1,32], index: 3, kind: input, shape index: {}]   ;;  %s627_s4 = inlined_call_operand.vmem [shape: f32[1,32], index: 4, kind: input, shape index: {}]   ;;  %s628_s5 = inlined_call_operand.<no memory space> [shape: f32[1], index: 5, kind: input, shape index: {}]   ;;  %s629_s6 = inlined_call_operand.vmem [shape: f32[2,5,128], index: 6, kind: output, shape index: {}]  }
   0x1   :  { %11 = sst [smem:[#allocation2]] %s628_s5 }
   0x2 LB: > { %s444_s24 = sadd.s32 4294967295, %s522_s23   ;;  %p448_p0 = scmp.ge.s32.totalorder %s522_s23, 1  ;;  %s522_s23 = sphi %s565_s23, %s17_s23  }
   0x3   : > { %p220_p1 = scmp.lt.s32.totalorder %s522_s23, 3 }
   0x5   : > { %p221_p2 = pnand %p448_p0, %p220_p1 }
   0x6   : > { %v263_v0 = vld [vmem:[%s625_s2] sm:$0xff] (!%p221_p2)  ;;  %v264_v1 = vld [vmem:[%s625_s2 + $0x8] sm:$0xff] (!%p221_p2)  ;;  %v265_v2 = vld [vmem:[%s625_s2 + $0x10] sm:$0xff] (!%p221_p2)  ;;  %v524_v3 = vmov (!%p221_p2), 0.0|0.0   ;;  %vm525_vm0 = vmmov (!%p221_p2), 0   ;;  %v526_v6 = vmov (!%p221_p2), 0.0   ;;  %v362_v20 = vlaneseq (!%p221_p2) }
   0x7   : > { %224 = sbr.rel (%p221_p2) target bundleno = 438 (0x1b6), region = 44  ;;  %485 = vmatprep.subr.bf16.mxu0 (!%p221_p2), %v524_v3  ;;  %v486_v4 = vpack.c.bf16 (!%p221_p2), %v264_v1, %v263_v0  ;;  %v266_v5 = vld [vmem:[%s625_s2 + $0x18] sm:$0xff] (!%p221_p2)  ;;  %482 = vmatprep.mubr.msk.f32.mxu0 (!%p221_p2), %vm525_vm0, %v526_v6  ;;  %p251_p3 = scmp.lt.s32.totalorder (!%p221_p2), %s444_s24, 1  ;;  %v267_v8 = vld [vmem:[%s625_s2 + $0x20] sm:$0xff] (!%p221_p2)  ;;  %v268_v9 = vld [vmem:[%s625_s2 + $0x28] sm:$0xff] (!%p221_p2)  ;;  %vm278_vm1 = vcmask (!%p221_p2), 523264  }
   0x8   : > { %v489_v7 = vpack.c.bf16 (!%p221_p2), %v266_v5, %v265_v2  ;;  %v492_v10 = vpack.c.bf16 (!%p221_p2), %v268_v9, %v267_v8  ;;  %v269_v11 = vld [vmem:[%s625_s2 + $0x30] sm:$0xff] (!%p221_p2)  ;;  %v270_v12 = vld [vmem:[%s625_s2 + $0x38] sm:$0xff] (!%p221_p2)  ;;  %v451_v15 = vld [vmem:[%s626_s3] ss:$0 sm:$0xff] (!%p221_p2)  ;;  %v363_v23 = vshrl.u32 (!%p221_p2), %v362_v20, 7  ;;  %vm368_vm2 = vcmask (!%p221_p2), 258048  }
   0x9   : > { %487 = vmatpush3.bf16.msra.mxu0 (!%p221_p2), %v486_v4  ;;  %v495_v13 = vpack.c.bf16 (!%p221_p2), %v270_v12, %v269_v11  ;;  %v359_v25 = vld [vmem:[%s627_s4] sm:$0x1] (!%p221_p2)  ;;  %s372_s28 = sld [smem:[#allocation2]] (!%p221_p2) }
   0xa   : > { %488 = vmatprep.subr.bf16.mxu0 (!%p221_p2), %v524_v3  ;;  %v364_v27 = vsub.s32 (!%p221_p2), 0, %v363_v23 }
   0xd   : > { %490 = vmatpush3.bf16.msra.mxu0 (!%p221_p2), %v489_v7 }
   0xe   : > { %s631_s24 = smov (!%p251_p3, %s444_s24), 1  ;;  %491 = vmatprep.subr.bf16.mxu0 %v524_v3 }
   0xf   : > { %s449_s16 = sshll.u32 %s631_s24, 3  ;;  %s257_s26 = scalar_lea.vmem %s624_s1, %s631_s24  ;;  %v373_v32 = vstv %s372_s28 }
  0x10   : > { %s254_s19 = scalar_lea.vmem %s623_s0, %s449_s16  ;;  %v358_v24 = vld [vmem:[%s257_s26] sm:$0x1]  ;;  %s261_s7 = scalar_lea.vmem %s629_s6, %s449_s16 }
  0x11   : > { %493 = vmatpush3.bf16.msra.mxu0 %v492_v10  ;;  %v262_v14 = vld [vmem:[%s254_s19] sm:$0x1f]  ;;  %v360_v26 = vmul.f32 %v359_v25, %v358_v24 }
  0x12   : > { %494 = vmatprep.subr.bf16.mxu0 %v524_v3 }
  0x13   : > { %v365_v28 = vrot.slane %v360_v26, %v364_v27 }
  0x15   : > { %496 = vmatpush3.bf16.msra.mxu0 %v495_v13 }
  0x18   : > { %483 = vmatmul.mubr.msk.f32.vlgmr.msra.gmra.mrb[0].mxu0 %vm278_vm1, %v262_v14 }
  0xeb   : > { %v348_v16 = vpop.f32.mrb[0].mxu0 }
  0xec   : > { %v349_v17 = vadd.f32 %v451_v15, %v348_v16  ;;  %v484_v18 = vpop.f32.mrb[1].mxu0 }
  0xee   : > { %v453_v19 = vmul.f32 -1.442695, %v349_v17 }
  0xf0   : > { %508 = vpow2.f32 %v453_v19 }
  0xfa   : > { %v509_v21 = vpop.eup %508 }
  0xfb   : > { %v355_v22 = vadd.f32 1.0, %v509_v21 }
  0xfd   : > { %510 = vrcp.f32 %v355_v22 }
 0x107   : > { %v511_v29 = vpop.eup %510 }
 0x108   : > { %v367_v30 = vmul.f32 %v511_v29, %v365_v28 }
 0x10a   : > { %v369_v31 = vsel %vm368_vm2, %v367_v30, 0.0 }
 0x10b   : > { %370 = vadd.xlane.f32.xlu0 %v369_v31 }
 0x198   : > { %v371_v33 = vpop.xlane.xlu0 %370 }
 0x199   : > { %v374_v34 = vadd.f32 %v373_v32, %v371_v33 }
 0x19b   : > { %v454_v35 = vmul.f32 -1.442695, %v374_v34 }
 0x19d   : > { %512 = vpow2.f32 %v454_v35 }
 0x1a7   : > { %v513_v36 = vpop.eup %512 }
 0x1a8   : > { %v378_v37 = vadd.f32 1.0, %v513_v36 }
 0x1aa   : > { %514 = vrcp.f32 %v378_v37 }
 0x1b4   : > { %v515_v38 = vpop.eup %514 }
 0x1b5   : > { %381 = vst [vmem:[%s261_s7] sm:$0x1f] %v515_v38 }
 0x1b6 PF: > { %s17_s23 = sadd.s32 1, %s522_s23  }
 0x1b7   : > { %p14_p4 = scmp.ge.s32.totalorder %s17_s23, 4  }
 0x1b9   :  { %16 = sbr.rel (!%p14_p4) target bundleno = 2 (0x2), region = 77 }

</bundles_post_ra>
